<compile_context>
chip_gen: v5e
topology: v5e:2x2
jax: 0.10.0
libtpu: 0.0.40
codegen_flags: <defaults>
</compile_context>

<pallas_src>
import functools

import jax
import jax.numpy as jnp
import numpy as np
from jax import lax
from jax.experimental import pallas as pl
from jax.experimental.pallas import tpu as pltpu

LEAK = 0.2


def _leaky(z):
    return jnp.where(z >= 0, z, LEAK * z)


# ------------------------- kernel 1: projections -----------------------------

def _proj_kernel(x_ref, wq_ref, wv_ref, wwb1_ref, bias_ref,
                 q_ref, v_ref, wb_ref, invn_ref):
    """Fused 1x1 convs (query f32 / value bf16), gating heads, inverse norms."""
    C = x_ref.shape[1]
    C4 = wwb1_ref.shape[0] // 2
    x = x_ref[0]                                     # (C, T) f32
    bp = bias_ref[...]                               # (2C + 4*C4 + 2, 1) f32

    nn = (((1,), (0,)), ((), ()))                    # plain (M,K)@(K,N)

    # Query 1x1 conv stays f32: it feeds the score matmul / softmax exponent,
    # where bf16 rounding caused the previous >1e-2 mismatches.
    q = lax.dot_general(wq_ref[...], x, nn,
                        preferred_element_type=jnp.float32) + bp[:C]

    # Value 1x1 conv: bf16 MXU operands, f32 accumulation.
    v = lax.dot_general(wv_ref[...], x.astype(jnp.bfloat16), nn,
                        preferred_element_type=jnp.float32) + bp[C:2 * C]

    # linear_weight | bias first 1x1 convs fused, LeakyReLU(0.2).  Kept f32 so
    # the sparse-gate threshold matches the reference.
    h = lax.dot_general(wwb1_ref[...], q, nn,
                        preferred_element_type=jnp.float32)
    h = _leaky(h + bp[2 * C:2 * C + 2 * C4])         # (2*C4, T)

    # Second 1x1 convs have a single output channel: VPU multiply + sublane
    # sum instead of an N=1 MXU matmul.
    t = h * bp[2 * C + 2 * C4:2 * C + 4 * C4]
    wei = jnp.sum(t[:C4], axis=0, keepdims=True)     # (1, T)
    bii = jnp.sum(t[C4:], axis=0, keepdims=True)     # (1, T)
    b2 = bp[2 * C + 4 * C4:]                         # (2, 1)

    # Inverse L2 patch norm (ksize == 1): rsqrt (EUP); equal to the reference's
    # 1 / max(sqrt(ss), 1e-4).
    ss = jnp.sum(q * q, axis=0, keepdims=True)
    invn = lax.rsqrt(jnp.maximum(ss, 1e-8))          # (1, T)

    q_ref[0] = q
    v_ref[0] = v.astype(v_ref.dtype)
    wb_ref[0, 0:1, :] = wei + b2[0:1]
    wb_ref[0, 1:2, :] = bii + b2[1:2]
    invn_ref[0] = invn


# ------------------ kernel 2: sparse-gated contextual attention --------------

def _attn_kernel(qt_ref, qf_ref, invn_ref, v_ref, wb_ref, y_ref, *,
                 softmax_scale):
    """One (batch, query-tile) step: f32 scores against all L patches,
    sparse-gated softmax over the patch (sublane) axis, bf16 value sum."""
    qt = qt_ref[0]                                   # (C, TQ) f32  query tile
    qf = qf_ref[0]                                   # (C, L)  f32  all patches
    invn = invn_ref[0]                               # (1, L)  f32
    wb = wb_ref[0]                                   # (2, TQ) f32
    wei = wb[0:1]
    bii = wb[1:2]

    # Normalised patches rebuilt in VMEM (no (B,L,C) wnt HBM tensor, no
    # in-kernel transpose).
    wn = qf * invn                                   # (C, L) f32

    # a[l, p] = <wn_l, q_p>: dim-0-contracting matmul, f32 MXU + f32 accum.
    a = lax.dot_general(wn, qt, (((0,), (0,)), ((), ())),
                        preferred_element_type=jnp.float32)   # (L, TQ)

    m = jnp.mean(a, axis=0, keepdims=True)                    # (1, TQ)
    sparse = jnp.maximum(a - m * wei + bii, 0.0)
    gate = sparse > 0.0
    if softmax_scale != 1.0:
        sparse = sparse * softmax_scale              # fold the softmax scale
    logits = a * sparse
    logits = logits - jnp.max(logits, axis=0, keepdims=True)
    e = jnp.exp(logits)
    p = e * pl.reciprocal(jnp.sum(e, axis=0, keepdims=True), approx=True)
    p = jnp.where(gate, jnp.maximum(p, 1e-8), 1e-8)  # merged gate + clamp

    # conv_transpose2d at ksize=1 == attention-weighted value sum: bf16 MXU.
    y = lax.dot_general(v_ref[0], p.astype(v_ref.dtype),
                        (((1,), (0,)), ((), ())),
                        preferred_element_type=jnp.float32)   # (C, TQ)
    y_ref[0] = y.astype(y_ref.dtype)


# ---------------- kernel 3: 3x3 conv + LeakyReLU + residual -------------------

def _conv3_kernel(y_ref, x_ref, w3_ref, b3_ref, o_ref, *, H, W):
    """3x3 conv as 3 matmuls with K = 3C: the three dw-shifted copies of y are
    sublane-stacked once, then each kh row is a single (C,3C)@(3C,L) matmul on
    a lane-rolled copy of the stack.  No im2col HBM intermediate."""
    C = x_ref.shape[1]
    L = H * W
    y = y_ref[0]                                     # (C, L) bf16
    x = x_ref[0]                                     # (C, L) f32

    pos = lax.broadcasted_iota(jnp.int32, (1, L), 1)
    hh = pos // W
    ww = pos - hh * W

    parts = []
    for dw in (-1, 0, 1):
        if dw == 0:
            parts.append(y)
        else:
            s = pltpu.roll(y, (-dw) % L, axis=1)     # s[c,l] = y[c, l+dw]
            parts.append(jnp.where((ww >= -dw) & (ww < W - dw), s, 0))
    stack = jnp.concatenate(parts, axis=0)           # (3C, L) bf16

    acc = jnp.zeros((C, L), jnp.float32)
    for kh, dh in enumerate((-1, 0, 1)):
        d = dh * W
        t = stack if d == 0 else pltpu.roll(stack, (-d) % L, axis=1)
        if dh != 0:
            t = jnp.where((hh >= -dh) & (hh < H - dh), t, 0)
        acc = acc + lax.dot_general(w3_ref[kh], t, (((1,), (0,)), ((), ())),
                                    preferred_element_type=jnp.float32)
    o_ref[0] = _leaky(acc + b3_ref[...]) + x


# ------------------------------ Wrapper ---------------------------------------

def _pick_tile(L):
    """Query-tile width: bounds the (L, TQ) score/softmax live set in VMEM.
    128-MiB-VMEM chips (v5e/v6e) take 512-wide tiles, 64-MiB (v7x) stays 256."""
    try:
        big_vmem = pltpu.get_tpu_info().vmem_capacity_bytes >= 100 * 1024 * 1024
    except Exception:          # unknown chip / interpret mode: be conservative
        big_vmem = False
    cap = 512 if big_vmem else 256
    if L <= cap:
        return L, big_vmem
    for tq in (512, 384, 256, 128):
        if tq <= cap and L % tq == 0:
            return tq, big_vmem
    return L, big_vmem         # L not a multiple of 128: single tile


def conattn_forward(x_nchw, params, *, ksize=1, softmax_scale=1.0):
    if ksize != 1:
        # TODO(synk): ksize > 1 patch-correlation path not implemented.
        raise NotImplementedError("only ksize=1 (module default) is supported")

    (wq, bq, wv, bv, ww1, bw1, ww2, bw2,
     wb1, bb1, wb2, bb2, w3, b3) = params
    B, C, H, W = x_nchw.shape
    L = H * W
    C4 = ww1.shape[0]
    assert C % 16 == 0 and 4 * C4 == C

    f32, bf16 = jnp.float32, jnp.bfloat16
    xf = x_nchw.reshape(B, C, L).astype(f32)

    # ---- pre-packed parameters (layout glue, done once outside the grid) ----
    col = lambda a: jnp.asarray(a, f32).reshape(-1, 1)
    wq_m = jnp.asarray(wq, f32)                                  # (C, C)
    wv_m = jnp.asarray(wv, bf16)                                 # (C, C)
    wwb1 = jnp.concatenate([ww1, wb1], axis=0).astype(f32)       # (2*C4, C)
    bias_pack = jnp.concatenate(
        [col(bq), col(bv), col(bw1), col(bb1),
         col(ww2[0]), col(wb2[0]), col(bw2), col(bb2)], axis=0)  # (2C+4C4+2, 1)
    # 3x3 weights restacked to (kh, O, 3*I): the three dw taps share one matmul.
    w3_stack = jnp.transpose(jnp.asarray(w3, f32),
                             (2, 0, 3, 1)).reshape(3, C, 3 * C).astype(bf16)
    b3c = col(b3)                                                # (C, 1)

    TQ, big_vmem = _pick_tile(L)
    grid2 = (B, L // TQ)
    mib = 1024 * 1024

    # ---- kernel 1: fused projections / gating heads / inverse patch norms ----
    q_all, v_all, wb_all, invn_all = pl.pallas_call(
        _proj_kernel,
        out_shape=(
            jax.ShapeDtypeStruct((B, C, L), f32),      # query (f32 score path)
            jax.ShapeDtypeStruct((B, C, L), bf16),     # value
            jax.ShapeDtypeStruct((B, 2, L), f32),      # [wei ; bii]
            jax.ShapeDtypeStruct((B, 1, L), f32),      # 1 / ||patch||
        ),
        grid=grid2,
        in_specs=[
            pl.BlockSpec((1, C, TQ), lambda b, i: (b, 0, i)),
            pl.BlockSpec((C, C), lambda b, i: (0, 0)),
            pl.BlockSpec((C, C), lambda b, i: (0, 0)),
            pl.BlockSpec((2 * C4, C), lambda b, i: (0, 0)),
            pl.BlockSpec((2 * C + 4 * C4 + 2, 1), lambda b, i: (0, 0)),
        ],
        out_specs=(
            pl.BlockSpec((1, C, TQ), lambda b, i: (b, 0, i)),
            pl.BlockSpec((1, C, TQ), lambda b, i: (b, 0, i)),
            pl.BlockSpec((1, 2, TQ), lambda b, i: (b, 0, i)),
            pl.BlockSpec((1, 1, TQ), lambda b, i: (b, 0, i)),
        ),
        compiler_params=pltpu.CompilerParams(
            dimension_semantics=("parallel", "parallel"),
            vmem_limit_bytes=32 * mib),
    )(xf, wq_m, wv_m, wwb1, bias_pack)

    # ---- kernel 2: sparse-gated contextual attention, tiled over queries ----
    # TODO(synk): flash-style key-axis tiling + pl.Buffered(1) on the
    #             batch-invariant q/v operands for very large L on v7x.
    y_att = pl.pallas_call(
        functools.partial(_attn_kernel, softmax_scale=softmax_scale),
        out_shape=jax.ShapeDtypeStruct((B, C, L), bf16),
        grid=grid2,
        in_specs=[
            pl.BlockSpec((1, C, TQ), lambda b, i: (b, 0, i)),    # query tile
            pl.BlockSpec((1, C, L), lambda b, i: (b, 0, 0)),     # all patches
            pl.BlockSpec((1, 1, L), lambda b, i: (b, 0, 0)),     # inverse norms
            pl.BlockSpec((1, C, L), lambda b, i: (b, 0, 0)),     # all values
            pl.BlockSpec((1, 2, TQ), lambda b, i: (b, 0, i)),    # wei|bii tile
        ],
        out_specs=pl.BlockSpec((1, C, TQ), lambda b, i: (b, 0, i)),
        compiler_params=pltpu.CompilerParams(
            dimension_semantics=("parallel", "parallel"),
            vmem_limit_bytes=(96 if big_vmem else 32) * mib),
    )(q_all, q_all, invn_all, v_all, wb_all)

    # ---- kernel 3: 3x3 conv + LeakyReLU + residual (reads y_att directly) ----
    # TODO(synk): tile over H with a 1-row halo for very large images / 2-TC v7x.
    out = pl.pallas_call(
        functools.partial(_conv3_kernel, H=H, W=W),
        out_shape=jax.ShapeDtypeStruct((B, C, L), f32),
        grid=(B,),
        in_specs=[
            pl.BlockSpec((1, C, L), lambda b: (b, 0, 0)),
            pl.BlockSpec((1, C, L), lambda b: (b, 0, 0)),
            pl.BlockSpec((3, C, 3 * C), lambda b: (0, 0, 0)),
            pl.BlockSpec((C, 1), lambda b: (0, 0)),
        ],
        out_specs=pl.BlockSpec((1, C, L), lambda b: (b, 0, 0)),
        compiler_params=pltpu.CompilerParams(
            dimension_semantics=("parallel",),
            vmem_limit_bytes=(64 if big_vmem else 32) * mib),
    )(y_att, xf, w3_stack, b3c)

    return out.reshape(B, C, H, W)


# --------------------------- Plain-JAX reference ------------------------------

def reference_forward(x, params, *, softmax_scale=1.0):
    (wq, bq, wv, bv, ww1, bw1, ww2, bw2,
     wb1, bb1, wb2, bb2, w3, b3) = params
    B, C, H, W = x.shape
    L = H * W

    def conv1x1(inp, w, b):
        return jnp.einsum('oi,bihw->bohw', w, inp) + b[None, :, None, None]

    x1 = conv1x1(x, wv, bv)      # value
    x2 = conv1x1(x, wq, bq)      # query
    wei = conv1x1(_leaky(conv1x1(x2, ww1, bw1)), ww2, bw2)   # (B,1,H,W)
    bii = conv1x1(_leaky(conv1x1(x2, wb1, bb1)), wb2, bb2)

    outs = []
    for b in range(B):
        q = x2[b]
        wi = q.reshape(C, L).T
        wn = wi / jnp.maximum(jnp.sqrt(jnp.sum(wi * wi, axis=1, keepdims=True)), 1e-4)
        yi = jnp.einsum('lc,chw->lhw', wn, q)
        m = jnp.mean(yi, axis=0, keepdims=True)
        sparse = jnp.maximum(yi - m * wei[b, 0] + bii[b, 0], 0.0)
        sparse_r = (sparse != 0.0).astype(jnp.float32)
        yi = yi * sparse
        yi = jax.nn.softmax(yi * softmax_scale, axis=0)
        yi = yi * sparse_r
        yi = jnp.maximum(yi, 1e-8)
        vi = x1[b].reshape(C, L).T
        outs.append(jnp.einsum('lhw,lc->chw', yi, vi))
    y = jnp.stack(outs, axis=0)
    y = lax.conv_general_dilated(
        y, w3, (1, 1), ((1, 1), (1, 1)),
        dimension_numbers=('NCHW', 'OIHW', 'NCHW'))
    y = _leaky(y + b3[None, :, None, None])
    return y + x


# ------------------------------ Param init ------------------------------------

def init_params(key, channels):
    C = channels
    C4 = C // 4
    ks = jax.random.split(key, 16)
    s = 0.1
    n = lambda k, shape: (s * jax.random.normal(k, shape)).astype(jnp.float32)
    wq, bq = n(ks[0], (C, C)), n(ks[1], (C,))
    wv, bv = n(ks[2], (C, C)), n(ks[3], (C,))
    ww1, bw1 = n(ks[4], (C4, C)), n(ks[5], (C4,))
    ww2, bw2 = n(ks[6], (1, C4)), n(ks[7], (1,))
    wb1, bb1 = n(ks[8], (C4, C)), n(ks[9], (C4,))
    wb2, bb2 = n(ks[10], (1, C4)), n(ks[11], (1,))
    w3, b3 = n(ks[12], (C, C, 3, 3)), n(ks[13], (C,))
    return (wq, bq, wv, bv, ww1, bw1, ww2, bw2,
            wb1, bb1, wb2, bb2, w3, b3)


if __name__ == "__main__":
    key = jax.random.PRNGKey(0)
    kx, kp = jax.random.split(key)

    B, C, H, W = 2, 32, 16, 16     # input_channels == output_channels == 32
    x = jax.random.normal(kx, (B, C, H, W), jnp.float32)
    params = init_params(kp, C)

    out = conattn_forward(x, params, ksize=1, softmax_scale=1.0)
    out = jax.block_until_ready(out)

    ref = reference_forward(x, params, softmax_scale=1.0)
    # Score/softmax path is f32 (exp amplifies rounding); the remaining bf16
    # value / 3x3-conv path is a documented precision choice -> atol 2e-2.
    np.testing.assert_allclose(np.asarray(out), np.asarray(ref),
                               rtol=1e-2, atol=2e-2)
    assert out.shape == (B, C, H, W) and bool(jnp.all(jnp.isfinite(out)))

    print("KERNEL_OK")
</pallas_src>

<mosaic_0001>
module attributes {stable_mosaic.version = 11 : i64} {
  func.func @_proj_kernel(%arg0: i32, %arg1: i32, %arg2: memref<1x32x256xf32, #tpu.memory_space<vmem>>, %arg3: memref<32x32xf32, #tpu.memory_space<vmem>>, %arg4: memref<32x32xbf16, #tpu.memory_space<vmem>>, %arg5: memref<16x32xf32, #tpu.memory_space<vmem>>, %arg6: memref<98x1xf32, #tpu.memory_space<vmem>>, %arg7: memref<1x32x256xf32, #tpu.memory_space<vmem>>, %arg8: memref<1x32x256xbf16, #tpu.memory_space<vmem>>, %arg9: memref<1x2x256xf32, #tpu.memory_space<vmem>>, %arg10: memref<1x1x256xf32, #tpu.memory_space<vmem>>) attributes {dimension_semantics = [#tpu.dimension_semantics<parallel>, #tpu.dimension_semantics<parallel>], iteration_bounds = array<i64: 2, 1>, scalar_prefetch = 0 : i64, scratch_operands = 0 : i64, tpu.core_type = #tpu.core_type<tc>, window_params = [{transform_indices = @transform_0, window_bounds = array<i64: 1, 32, 256>}, {pipeline_mode = #tpu.pipeline_mode<synchronous>, transform_indices = @transform_1, window_bounds = array<i64: 32, 32>}, {pipeline_mode = #tpu.pipeline_mode<synchronous>, transform_indices = @transform_2, window_bounds = array<i64: 32, 32>}, {pipeline_mode = #tpu.pipeline_mode<synchronous>, transform_indices = @transform_3, window_bounds = array<i64: 16, 32>}, {pipeline_mode = #tpu.pipeline_mode<synchronous>, transform_indices = @transform_4, window_bounds = array<i64: 98, 1>}, {transform_indices = @transform_5, window_bounds = array<i64: 1, 32, 256>}, {transform_indices = @transform_6, window_bounds = array<i64: 1, 32, 256>}, {transform_indices = @transform_7, window_bounds = array<i64: 1, 2, 256>}, {transform_indices = @transform_8, window_bounds = array<i64: 1, 1, 256>}]} {
    %c0 = arith.constant 0 : index
    %c0_0 = arith.constant 0 : index
    %c0_1 = arith.constant 0 : index
    %0 = vector.load %arg2[%c0, %c0_0, %c0_1] : memref<1x32x256xf32, #tpu.memory_space<vmem>>, vector<1x32x256xf32>
    %1 = vector.shape_cast %0 : vector<1x32x256xf32> to vector<32x256xf32>
    %c0_2 = arith.constant 0 : index
    %c0_3 = arith.constant 0 : index
    %2 = vector.load %arg6[%c0_2, %c0_3] : memref<98x1xf32, #tpu.memory_space<vmem>>, vector<98x1xf32>
    %c0_4 = arith.constant 0 : index
    %c0_5 = arith.constant 0 : index
    %3 = vector.load %arg3[%c0_4, %c0_5] : memref<32x32xf32, #tpu.memory_space<vmem>>, vector<32x32xf32>
    %cst = arith.constant dense<0.000000e+00> : vector<32x256xf32>
    %4 = tpu.matmul %3, %1, %cst {dimension_numbers = #tpu.dot_dimension_numbers<[1], [0], [0], [1], [0, 0, 1, 1], [], []>} : vector<32x32xf32>, vector<32x256xf32>, vector<32x256xf32> -> vector<32x256xf32>
    %5 = vector.extract_strided_slice %2 {offsets = [0, 0], sizes = [32, 1], strides = [1, 1]} : vector<98x1xf32> to vector<32x1xf32>
    %6 = vector.broadcast %5 : vector<32x1xf32> to vector<32x256xf32>
    %7 = arith.addf %4, %6 : vector<32x256xf32>
    %c0_6 = arith.constant 0 : index
    %c0_7 = arith.constant 0 : index
    %8 = vector.load %arg4[%c0_6, %c0_7] : memref<32x32xbf16, #tpu.memory_space<vmem>>, vector<32x32xbf16>
    %9 = arith.truncf %1 : vector<32x256xf32> to vector<32x256xbf16>
    %cst_8 = arith.constant dense<0.000000e+00> : vector<32x256xf32>
    %10 = tpu.matmul %8, %9, %cst_8 {dimension_numbers = #tpu.dot_dimension_numbers<[1], [0], [0], [1], [0, 0, 1, 1], [], []>} : vector<32x32xbf16>, vector<32x256xbf16>, vector<32x256xf32> -> vector<32x256xf32>
    %11 = vector.extract_strided_slice %2 {offsets = [32, 0], sizes = [32, 1], strides = [1, 1]} : vector<98x1xf32> to vector<32x1xf32>
    %12 = vector.broadcast %11 : vector<32x1xf32> to vector<32x256xf32>
    %13 = arith.addf %10, %12 : vector<32x256xf32>
    %c0_9 = arith.constant 0 : index
    %c0_10 = arith.constant 0 : index
    %14 = vector.load %arg5[%c0_9, %c0_10] : memref<16x32xf32, #tpu.memory_space<vmem>>, vector<16x32xf32>
    %cst_11 = arith.constant dense<0.000000e+00> : vector<16x256xf32>
    %15 = tpu.matmul %14, %7, %cst_11 {dimension_numbers = #tpu.dot_dimension_numbers<[1], [0], [0], [1], [0, 0, 1, 1], [], []>} : vector<16x32xf32>, vector<32x256xf32>, vector<16x256xf32> -> vector<16x256xf32>
    %16 = vector.extract_strided_slice %2 {offsets = [64, 0], sizes = [16, 1], strides = [1, 1]} : vector<98x1xf32> to vector<16x1xf32>
    %17 = vector.broadcast %16 : vector<16x1xf32> to vector<16x256xf32>
    %18 = arith.addf %15, %17 : vector<16x256xf32>
    %cst_12 = arith.constant 0.000000e+00 : f32
    %19 = vector.broadcast %cst_12 : f32 to vector<16x256xf32>
    %20 = arith.cmpf oge, %18, %19 : vector<16x256xf32>
    %cst_13 = arith.constant 2.000000e-01 : f32
    %21 = vector.broadcast %cst_13 : f32 to vector<16x256xf32>
    %22 = arith.mulf %21, %18 : vector<16x256xf32>
    %23 = arith.select %20, %18, %22 : vector<16x256xi1>, vector<16x256xf32>
    %24 = vector.extract_strided_slice %2 {offsets = [80, 0], sizes = [16, 1], strides = [1, 1]} : vector<98x1xf32> to vector<16x1xf32>
    %25 = vector.broadcast %24 : vector<16x1xf32> to vector<16x256xf32>
    %26 = arith.mulf %23, %25 : vector<16x256xf32>
    %27 = vector.extract_strided_slice %26 {offsets = [0, 0], sizes = [8, 256], strides = [1, 1]} : vector<16x256xf32> to vector<8x256xf32>
    %cst_14 = arith.constant dense<0.000000e+00> : vector<256xf32>
    %28 = vector.multi_reduction <add>, %27, %cst_14 [0] : vector<8x256xf32> to vector<256xf32>
    %29 = vector.shape_cast %28 : vector<256xf32> to vector<1x256xf32>
    %30 = vector.extract_strided_slice %26 {offsets = [8, 0], sizes = [8, 256], strides = [1, 1]} : vector<16x256xf32> to vector<8x256xf32>
    %cst_15 = arith.constant dense<0.000000e+00> : vector<256xf32>
    %31 = vector.multi_reduction <add>, %30, %cst_15 [0] : vector<8x256xf32> to vector<256xf32>
    %32 = vector.shape_cast %31 : vector<256xf32> to vector<1x256xf32>
    %33 = vector.extract_strided_slice %2 {offsets = [96, 0], sizes = [2, 1], strides = [1, 1]} : vector<98x1xf32> to vector<2x1xf32>
    %34 = arith.mulf %7, %7 : vector<32x256xf32>
    %cst_16 = arith.constant dense<0.000000e+00> : vector<256xf32>
    %35 = vector.multi_reduction <add>, %34, %cst_16 [0] : vector<32x256xf32> to vector<256xf32>
    %36 = vector.shape_cast %35 : vector<256xf32> to vector<1x256xf32>
    %cst_17 = arith.constant 9.99999993E-9 : f32
    %37 = vector.broadcast %cst_17 : f32 to vector<1x256xf32>
    %38 = arith.maximumf %36, %37 : vector<1x256xf32>
    %39 = math.rsqrt %38 : vector<1x256xf32>
    %c0_18 = arith.constant 0 : index
    %c0_19 = arith.constant 0 : index
    %c0_20 = arith.constant 0 : index
    %40 = vector.load %arg7[%c0_18, %c0_19, %c0_20] : memref<1x32x256xf32, #tpu.memory_space<vmem>>, vector<1x32x256xf32>
    %41 = vector.shape_cast %40 : vector<1x32x256xf32> to vector<32x256xf32>
    %42 = vector.shape_cast %7 : vector<32x256xf32> to vector<1x32x256xf32>
    tpu.vector_store %arg7[%c0_18, %c0_19, %c0_20], %42 {strides = array<i32>} : memref<1x32x256xf32, #tpu.memory_space<vmem>>, vector<1x32x256xf32>,
    %43 = arith.truncf %13 : vector<32x256xf32> to vector<32x256xbf16>
    %c0_21 = arith.constant 0 : index
    %c0_22 = arith.constant 0 : index
    %c0_23 = arith.constant 0 : index
    %44 = vector.load %arg8[%c0_21, %c0_22, %c0_23] : memref<1x32x256xbf16, #tpu.memory_space<vmem>>, vector<1x32x256xbf16>
    %45 = vector.shape_cast %44 : vector<1x32x256xbf16> to vector<32x256xbf16>
    %46 = vector.shape_cast %43 : vector<32x256xbf16> to vector<1x32x256xbf16>
    tpu.vector_store %arg8[%c0_21, %c0_22, %c0_23], %46 {strides = array<i32>} : memref<1x32x256xbf16, #tpu.memory_space<vmem>>, vector<1x32x256xbf16>,
    %47 = vector.extract_strided_slice %33 {offsets = [0, 0], sizes = [1, 1], strides = [1, 1]} : vector<2x1xf32> to vector<1x1xf32>
    %48 = vector.broadcast %47 : vector<1x1xf32> to vector<1x256xf32>
    %49 = arith.addf %29, %48 : vector<1x256xf32>
    %c0_24 = arith.constant 0 : index
    %c0_25 = arith.constant 0 : index
    %c0_26 = arith.constant 0 : index
    %50 = vector.load %arg9[%c0_24, %c0_25, %c0_26] : memref<1x2x256xf32, #tpu.memory_space<vmem>>, vector<1x1x256xf32>
    %51 = vector.shape_cast %50 : vector<1x1x256xf32> to vector<1x256xf32>
    %52 = vector.shape_cast %49 : vector<1x256xf32> to vector<1x1x256xf32>
    tpu.vector_store %arg9[%c0_24, %c0_25, %c0_26], %52 {strides = array<i32>} : memref<1x2x256xf32, #tpu.memory_space<vmem>>, vector<1x1x256xf32>,
    %53 = vector.extract_strided_slice %33 {offsets = [1, 0], sizes = [1, 1], strides = [1, 1]} : vector<2x1xf32> to vector<1x1xf32>
    %54 = vector.broadcast %53 : vector<1x1xf32> to vector<1x256xf32>
    %55 = arith.addf %32, %54 : vector<1x256xf32>
    %c0_27 = arith.constant 0 : index
    %c1 = arith.constant 1 : index
    %c0_28 = arith.constant 0 : index
    %56 = vector.load %arg9[%c0_27, %c1, %c0_28] : memref<1x2x256xf32, #tpu.memory_space<vmem>>, vector<1x1x256xf32>
    %57 = vector.shape_cast %56 : vector<1x1x256xf32> to vector<1x256xf32>
    %58 = vector.shape_cast %55 : vector<1x256xf32> to vector<1x1x256xf32>
    tpu.vector_store %arg9[%c0_27, %c1, %c0_28], %58 {strides = array<i32>} : memref<1x2x256xf32, #tpu.memory_space<vmem>>, vector<1x1x256xf32>,
    %c0_29 = arith.constant 0 : index
    %c0_30 = arith.constant 0 : index
    %c0_31 = arith.constant 0 : index
    %59 = vector.load %arg10[%c0_29, %c0_30, %c0_31] : memref<1x1x256xf32, #tpu.memory_space<vmem>>, vector<1x1x256xf32>
    %60 = vector.shape_cast %59 : vector<1x1x256xf32> to vector<1x256xf32>
    %61 = vector.shape_cast %39 : vector<1x256xf32> to vector<1x1x256xf32>
    tpu.vector_store %arg10[%c0_29, %c0_30, %c0_31], %61 {strides = array<i32>} : memref<1x1x256xf32, #tpu.memory_space<vmem>>, vector<1x1x256xf32>,
    return
  }
  func.func @transform_0(%arg0: i32, %arg1: i32) -> (i32, i32, i32) {
    %c0_i32 = arith.constant 0 : i32
    %c0_i32_0 = arith.constant 0 : i32
    return %arg0, %c0_i32, %arg1 : i32, i32, i32
  }
  func.func @transform_1(%arg0: i32, %arg1: i32) -> (i32, i32) {
    %c0_i32 = arith.constant 0 : i32
    %c0_i32_0 = arith.constant 0 : i32
    %c0_i32_1 = arith.constant 0 : i32
    return %c0_i32, %c0_i32_0 : i32, i32
  }
  func.func @transform_2(%arg0: i32, %arg1: i32) -> (i32, i32) {
    %c0_i32 = arith.constant 0 : i32
    %c0_i32_0 = arith.constant 0 : i32
    %c0_i32_1 = arith.constant 0 : i32
    return %c0_i32, %c0_i32_0 : i32, i32
  }
  func.func @transform_3(%arg0: i32, %arg1: i32) -> (i32, i32) {
    %c0_i32 = arith.constant 0 : i32
    %c0_i32_0 = arith.constant 0 : i32
    %c0_i32_1 = arith.constant 0 : i32
    return %c0_i32, %c0_i32_0 : i32, i32
  }
  func.func @transform_4(%arg0: i32, %arg1: i32) -> (i32, i32) {
    %c0_i32 = arith.constant 0 : i32
    %c0_i32_0 = arith.constant 0 : i32
    %c0_i32_1 = arith.constant 0 : i32
    return %c0_i32, %c0_i32_0 : i32, i32
  }
  func.func @transform_5(%arg0: i32, %arg1: i32) -> (i32, i32, i32) {
    %c0_i32 = arith.constant 0 : i32
    %c0_i32_0 = arith.constant 0 : i32
    return %arg0, %c0_i32, %arg1 : i32, i32, i32
  }
  func.func @transform_6(%arg0: i32, %arg1: i32) -> (i32, i32, i32) {
    %c0_i32 = arith.constant 0 : i32
    %c0_i32_0 = arith.constant 0 : i32
    return %arg0, %c0_i32, %arg1 : i32, i32, i32
  }
  func.func @transform_7(%arg0: i32, %arg1: i32) -> (i32, i32, i32) {
    %c0_i32 = arith.constant 0 : i32
    %c0_i32_0 = arith.constant 0 : i32
    return %arg0, %c0_i32, %arg1 : i32, i32, i32
  }
  func.func @transform_8(%arg0: i32, %arg1: i32) -> (i32, i32, i32) {
    %c0_i32 = arith.constant 0 : i32
    %c0_i32_0 = arith.constant 0 : i32
    return %arg0, %c0_i32, %arg1 : i32, i32, i32
  }
}

</mosaic_0001>

<bundles_post_ra>
// kernel: tpu_custom_call.1
= control target key start
LH: loop header
LB: loop body
LE: loop exit
PB: predicated region body
PF: predicated region fallthrough
CT: control target
= control target key end

     0   :  { %s1808_s0 = inlined_call_operand.hbm [shape: f32[2,32,256], index: 0, kind: input, shape index: {}]   ;;  %s1809_s1 = inlined_call_operand.vmem [shape: f32[32,32], index: 1, kind: input, shape index: {}]   ;;  %s1810_s2 = inlined_call_operand.vmem [shape: bf16[32,32], index: 2, kind: input, shape index: {}]   ;;  %s1811_s3 = inlined_call_operand.vmem [shape: f32[16,32], index: 3, kind: input, shape index: {}]   ;;  %s1812_s4 = inlined_call_operand.vmem [shape: f32[98,1], index: 4, kind: input, shape index: {}]   ;;  %s1813_s5 = inlined_call_operand.hbm [shape: f32[2,32,256], index: 5, kind: output, shape index: {0}]   ;;  %s1814_s6 = inlined_call_operand.hbm [shape: bf16[2,32,256], index: 6, kind: output, shape index: {1}]   ;;  %s1815_s7 = inlined_call_operand.hbm [shape: f32[2,2,256], index: 7, kind: output, shape index: {2}]   ;;  %s1816_s8 = inlined_call_operand.hbm [shape: f32[2,1,256], index: 8, kind: output, shape index: {3}]  }
   0x1   :  { %1821 = sst [smem:[#allocation19_spill]] %s1808_s0 }
   0x2   :  { %1822 = sst [smem:[#allocation20_spill]] %s1809_s1 }
   0x3   :  { %14 = vsyncpa [#allocation3], 0 }
   0x4   :  { %16 = vsyncpa [#allocation3 + $0x1], 0 }
   0x5   :  { %17 = vsyncpa [#allocation4], 0 }
   0x6   :  { %19 = vsyncpa [#allocation4 + $0x1], 0 }
   0x7   :  { %20 = vsyncpa [#allocation7], 0 }
   0x8   :  { %22 = vsyncpa [#allocation7 + $0x1], 0 }
   0x9   :  { %23 = vsyncpa [#allocation10], 0 }
   0xa   :  { %25 = vsyncpa [#allocation10 + $0x1], 0  ;;  %s1485_s27 = smov 0   ;;  %s1487_s28 = smov 0  }
   0xb   :  { %s1489_s29 = smov 0   ;;  %s1491_s30 = smov 0  }
   0xc   :  { %s1493_s9 = smov 0   ;;  %s1495_s10 = smov 0  }
   0xd LB: > { %1823 = sst [smem:[#allocation15_spill]] %s1411_s27  ;;  %s1516_s11 = sadd.s32 4294967295, %s1431_s10   ;;  %s1431_s10 = sphi %s1495_s10, %s31_s10   ;;  %s1427_s9 = sphi %s1493_s9, %s1841_s9   ;;  %s1423_s30 = sphi %s1491_s30, %s1840_s30   ;;  %s1419_s29 = sphi %s1489_s29, %s1844_s29   ;;  %s1415_s28 = sphi %s1487_s28, %s1843_s28   ;;  %s1411_s27 = sphi %s1485_s27, %s1842_s27  }
   0xe   : > { %1824 = sst [smem:[#allocation16_spill]] %s1427_s9  ;;  %s1819_s12 = sadd.s32 4294967294, %s1431_s10  }
   0xf   : > { %s43_s13 = sadd.s32 1, %s1427_s9  ;;  %s52_s14 = sadd.s32 1, %s1419_s29 }
  0x10   : > { %p45_p0 = scmp.ge.s32.totalorder %s43_s13, 2  ;;  %p59_p1 = scmp.ne.s32.totalorder %s1419_s29, %s1415_s28 }
  0x11   : > { %p60_p2 = scmp.eq.s32.totalorder %s1431_s10, 0  ;;  %p65_p3 = scmp.ne.s32.totalorder %s1415_s28, %s1411_s27 }
  0x12   : > { %s1846_s13 = smov (%p45_p0, %s43_s13), 0  ;;  %p66_p5 = scmp.eq.s32.totalorder %s1516_s11, 0 }
  0x13   : > { %1825 = sst [smem:[#allocation17_spill]] %s1846_s13  ;;  %p1528_p4 = por %p60_p2, %p59_p1 }
  0x14   : > { %s47_s16 = ssub.s32 %s1427_s9, %s1846_s13  ;;  %p175_p6 = scmp.eq.s32.totalorder %s1516_s11, 1 }
  0x15   : > { %p50_p7 = scmp.eq.s32.totalorder %s47_s16, 0  ;;  %p1536_p8 = por %p66_p5, %p65_p3 }
  0x16   : > { %p1540_p9 = por %p175_p6, %p59_p1  ;;  %p181_p10 = scmp.eq.s32.totalorder %s1819_s12, 1 }
  0x17   : > { %s1547_s19 = scalar_select %p50_p7, %s1419_s29, %s52_s14  }
  0x18   : > { %p1549_p11 = por %p181_p10, %p65_p3  ;;  %p1074_p12 = scmp.ge.s32.totalorder %s1431_s10, 2 }
  0x19   : > { %1829 = sst [smem:[#allocation18_spill]] %s1547_s19  ;;  %p1163_p13 = scmp.lt.s32.totalorder %s1431_s10, 2 }
  0x1a   : > { %s297_s21 = sand.u32 1, %s1419_s29   ;;  %s1122_s23 = sshll.u32 %s1427_s9, 6 }
  0x1b   : > { %s1075_s22 = sshll.u32 %s297_s21, 6  ;;  %s1831_s0 = sld [smem:[#allocation19_spill]] }
  0x1c   : > { %s301_s16 = scalar_lea.vmem [#allocation2], %s1075_s22  ;;  %p1147_p0 = pnand %p1163_p13, %p1528_p4 }
  0x1d   : > { %s311_s13 = sshll.u32 %s301_s16, 4  ;;  %p1078_p1 = scmp.ge.s32.totalorder %s1431_s10, 1  ;;  %s312_s13 = int_to_ptr.vmem [resolvable:$true] %s311_s13 }
  0x1e   : > { %s298_s14 = scalar_lea.sflag [#allocation3], %s297_s21  ;;  %s1433_s12 = smov 256  }
  0x1f   : > { %s1434_s19 = smov 16   ;;  %p319_p2 = scmp.lt.s32.totalorder %s1431_s10, 3 }
  0x21   : > { %s308_s26 = scalar_lea.hbm %s1831_s0, %s1122_s23  ;;  %p320_p3 = pnand %p1078_p1, %p319_p2 }
  0x22   : > { %s309_s27 = sshll.u32 %s308_s26, 4  ;;  %s1565_s9 = sand.u32 (!%p320_p3), 1, %s1415_s28   ;;  %s310_s27 = int_to_ptr.hbm [resolvable:$true] %s309_s27 }
  0x23   : > { %1149 = dma.hbm_to_vmem [thread:$0]  (!%p1147_p0), %s310_s27, 1024, %s312_s13, %s298_s14, %s1433_s12, %s1433_s12, %s1434_s19  }
  0x24   : > { %323 = sbr.rel (%p320_p3) target bundleno = 369 (0x171), region = 40  ;;  %s1079_s22 = sshll.u32 (!%p320_p3), %s1565_s9, 6 }
  0x25   : > { %s326_s23 = scalar_lea.sflag (!%p320_p3), [#allocation3], %s1565_s9  ;;  %s329_s15 = scalar_lea.vmem (!%p320_p3), [#allocation2], %s1079_s22 }
  0x29   : > { %1394 = dma.done.wait (%p1536_p8), %s326_s23, 1024  }
  0x2a   : > { %1396 = vsyncadd (%p1536_p8), %s326_s23, 4294966272  ;;  %v1435_v0 = vmov 0   ;;  %v395_v1 = vld [vmem:[%s1812_s4 + $0x18] sm:$0xff]  ;;  %v391_v3 = vld [vmem:[%s329_s15 + $0x38] sm:$0xff]  ;;  %s1832_s1 = sld [smem:[#allocation20_spill]]  ;;  %vm429_vm0 = vcmask 261120  }
  0x2b   : > { %1220 = vset.pattern.permute.xlu0 %v1435_v0  ;;  %1221 = vset.pattern.permute.xlu1 %v1435_v0  ;;  %v390_v2 = vld [vmem:[%s329_s15 + $0x30] sm:$0xff]  ;;  %v388_v4 = vld [vmem:[%s329_s15 + $0x20] sm:$0xff]  ;;  %v389_v5 = vld [vmem:[%s329_s15 + $0x28] sm:$0xff]  ;;  %s1634_s19 = scalar_lea.vmem [#allocation5], %s1079_s22  ;;  %s1081_s24 = sshll.u32 %s1565_s9, 5  ;;  %vm770_vm5 = vcmask 1040384  }
  0x2c   : > { %1222 = vset.pattern.permute.xlu2 %v1435_v0  ;;  %426 = vperm.xlu0 %1220, %v395_v1   ;;  %v386_v6 = vld [vmem:[%s329_s15 + $0x10] sm:$0xff]  ;;  %v387_v7 = vld [vmem:[%s329_s15 + $0x18] sm:$0xff]  ;;  %v384_v8 = vld [vmem:[%s329_s15] sm:$0xff]  ;;  %v506_v13 = vpack.c.bf16 %v390_v2, %v388_v4  ;;  %v507_v14 = vpack.c.bf16 %v391_v3, %v389_v5  ;;  %s1655_s16 = scalar_lea.vmem [#allocation6], %s1081_s24  ;;  %s825_s21 = sshll.u32 %s1634_s19, 4  ;;  %s1682_s21 = int_to_ptr.vmem [resolvable:$true] %s825_s21 }
  0x2d   : > { %454 = vmatpush.msra.mxu0 %v390_v2  ;;  %1128 = vmatpush.msra.mxu2 %v390_v2  ;;  %v385_v9 = vld [vmem:[%s329_s15 + $0x8] sm:$0xff]  ;;  %v393_v15 = vld [vmem:[%s1812_s4 + $0x8] sm:$0xff]  ;;  %v504_v16 = vpack.c.bf16 %v386_v6, %v384_v8  ;;  %v1123_v19 = vld [vmem:[%s1810_s2] sm:$0xff]  ;;  %s1083_s24 = sshll.u32 %s1565_s9, 1  ;;  %s1125_s25 = sshll.u32 %s1423_s30, 6 }
  0x2e   : > { %483 = vmatpush.msra.mxu1 %v391_v3  ;;  %1132 = vmatpush.msra.mxu3 %v391_v3  ;;  %v394_v12 = vld [vmem:[%s1812_s4 + $0x10] sm:$0xff]  ;;  %v505_v17 = vpack.c.bf16 %v387_v7, %v385_v9  ;;  %v403_v20 = vld [vmem:[%s1812_s4 + $0x58] sm:$0xff]  ;;  %v392_v21 = vld [vmem:[%s1812_s4] sm:$0xff]  ;;  %s796_s15 = scalar_lea.sflag [#allocation4], %s1565_s9  ;;  %s1277_s22 = scalar_lea.hbm %s1813_s5, 128 }
  0x2f   : > { %455 = vmatpush.msra.mxu0 %v388_v4  ;;  %1129 = vmatpush.msra.mxu2 %v388_v4  ;;  %v396_v23 = vld [vmem:[%s1812_s4 + $0x20] sm:$0xff]  ;;  %v402_v24 = vld [vmem:[%s1812_s4 + $0x50] sm:$0xff]  ;;  %v1124_v25 = vld [vmem:[%s1810_s2 + $0x8] sm:$0xff] }
  0x30   : > { %484 = vmatpush.msra.mxu1 %v389_v5  ;;  %1133 = vmatpush.msra.mxu3 %v389_v5  ;;  %v405_v10 = vld [vmem:[%s1832_s1] sm:$0xff]  ;;  %v408_v11 = vld [vmem:[%s1832_s1 + $0x18] sm:$0xff]  ;;  %v406_v18 = vld [vmem:[%s1832_s1 + $0x8] sm:$0xff] }
  0x31   : > { %456 = vmatpush.msra.mxu0 %v386_v6  ;;  %1130 = vmatpush.msra.mxu2 %v386_v6  ;;  %v407_v22 = vld [vmem:[%s1832_s1 + $0x10] sm:$0xff]  ;;  %v399_v26 = vld [vmem:[%s1812_s4 + $0x38] sm:$0xff]  ;;  %v397_v27 = vld [vmem:[%s1812_s4 + $0x28] sm:$0xff] }
  0x32   : > { %485 = vmatpush.msra.mxu1 %v387_v7  ;;  %1134 = vmatpush.msra.mxu3 %v387_v7  ;;  %v401_v45 = vld [vmem:[%s1812_s4 + $0x48] sm:$0xff]  ;;  %v400_v60 = vld [vmem:[%s1812_s4 + $0x40] sm:$0xff] }
  0x33   : > { %457 = vmatpush.msra.mxu0 %v384_v8  ;;  %1131 = vmatpush.msra.mxu2 %v384_v8  ;;  %v582_v4 = vld [vmem:[%s1811_s3] sm:$0xff] }
  0x34   : > { %486 = vmatpush.msra.mxu1 %v385_v9  ;;  %1135 = vmatpush.msra.mxu3 %v385_v9 }
  0x35   : > { %1084 = vmatmul.msk.f32.vlgmr.msra.gmra.mxu0 %vm429_vm0, %v405_v10  ;;  %1087 = vmatmul.msk.f32.vlgmr.msra.gmra.mxu2 %vm429_vm0, %v408_v11 }
  0x36   : > { %1088 = vmatmul.msk.f32.vlgmr.msra.gmra.mxu1 %vm429_vm0, %v405_v10  ;;  %1091 = vmatmul.msk.f32.vlgmr.msra.gmra.mxu3 %vm429_vm0, %v408_v11 }
  0x37   : > { %421 = vperm.xlu0 %1220, %v394_v12   ;;  %550 = vmatpush.bf16.msrb.mxu2 %v506_v13 }
  0x38   : > { %569 = vmatpush.bf16.msrb.mxu3 %v507_v14  ;;  %416 = vperm.xlu1 %1221, %v393_v15  }
  0x39   : > { %591 = vperm.xlu2 %1222, %v401_v45  }
  0x3b   : > { %551 = vmatpush.bf16.msrb.mxu2 %v504_v16  ;;  %v404_v16 = vld [vmem:[%s1812_s4 + $0x60] sm:$0x3] }
  0x3c   : > { %570 = vmatpush.bf16.msrb.mxu3 %v505_v17 }
  0x3d   : > { %1085 = vmatmul.msk.f32.gmra.mxu0 %vm429_vm0, %v406_v18 }
  0x3e   : > { %1089 = vmatmul.msk.f32.gmra.mxu1 %vm429_vm0, %v406_v18  ;;  %1100 = vmatmul.msk.bf16.vlgmr.msrb.gmra.mxu2 %vm429_vm0, %v1123_v19 }
  0x3f   : > { %1102 = vmatmul.msk.bf16.vlgmr.msrb.gmra.mxu3 %vm429_vm0, %v1123_v19  ;;  %665 = vperm.xlu0 %1220, %v403_v20  }
  0x40   : > { %411 = vperm.xlu1 %1221, %v392_v21   ;;  %v583_v21 = vld [vmem:[%s1811_s3 + $0x8] sm:$0xff] }
  0x41   : > { %586 = vperm.xlu2 %1222, %v400_v60  }
  0x45   : > { %1086 = vmatmul.msk.f32.gmra.mxu0 %vm429_vm0, %v407_v22 }
  0x46   : > { %1090 = vmatmul.msk.f32.gmra.mxu1 %vm429_vm0, %v407_v22 }
  0x47   : > { %510 = vperm.xlu0 %1220, %v396_v23  }
  0x48   : > { %660 = vperm.xlu1 %1221, %v402_v24  }
  0x49   : > { %762 = vperm.xlu2 %1222, %v404_v16  }
  0x4e   : > { %1101 = vmatmul.msk.bf16.gmra.mxu2 %vm429_vm0, %v1124_v25 }
  0x4f   : > { %1103 = vmatmul.msk.bf16.gmra.mxu3 %vm429_vm0, %v1124_v25  ;;  %525 = vperm.xlu0 %1220, %v399_v26  }
  0x50   : > { %515 = vperm.xlu1 %1221, %v397_v27  }
  0x9e   : > { %v427_v28 = vpop.permute.xlu0 %426 }
  0xa9   : > { %v422_v30 = vpop.permute.xlu0 %421 }
  0xaa   : > { %v417_v29 = vpop.permute.xlu1 %416 }
  0xb1   : > { %v1638_v36 = vpop.permute.xlu0 %665 }
  0xb2   : > { %v459_v31 = vpop.f32.mrf.mxu0  ;;  %v412_v32 = vpop.permute.xlu1 %411 }
  0xb3   : > { %v488_v33 = vpop.f32.mrf.mxu1  ;;  %v460_v34 = vadd.f32 %v459_v31, %v412_v32 }
  0xb4   : > { %v489_v35 = vadd.f32 %v488_v33, %v412_v32 }
  0xb5   : > { %744 = vst [vmem:[%s1634_s19] sm:$0xff] %v460_v34  ;;  %v696_v54 = vmul.f32 %v460_v34, %v460_v34 }
  0xb6   : > { %745 = vst [vmem:[%s1634_s19 + $0x8] sm:$0xff] %v489_v35  ;;  %v697_v58 = vmul.f32 %v489_v35, %v489_v35 }
  0xb8   : > { %v468_v37 = vpop.f32.mrf.mxu2 }
  0xb9   : > { %v469_v38 = vadd.f32 %v468_v37, %v427_v28  ;;  %v497_v39 = vpop.f32.mrf.mxu3  ;;  %v511_v47 = vpop.permute.xlu0 %510 }
  0xba   : > { %v498_v40 = vadd.f32 %v497_v39, %v427_v28  ;;  %v462_v41 = vpop.f32.mrf.mxu0  ;;  %v1647_v46 = vpop.permute.xlu1 %660 }
  0xbb   : > { %v491_v42 = vpop.f32.mrf.mxu1  ;;  %750 = vst [vmem:[%s1634_s19 + $0x30] sm:$0xff] %v469_v38  ;;  %v463_v43 = vadd.f32 %v462_v41, %v417_v29  ;;  %612 = vmatpush.msrb.mxu0 %v469_v38  ;;  %v702_v2 = vmul.f32 %v469_v38, %v469_v38 }
  0xbc   : > { %v492_v44 = vadd.f32 %v491_v42, %v417_v29  ;;  %751 = vst [vmem:[%s1634_s19 + $0x38] sm:$0xff] %v498_v40  ;;  %635 = vmatpush.msrb.mxu1 %v498_v40  ;;  %v703_v5 = vmul.f32 %v498_v40, %v498_v40  ;;  %v398_v29 = vld [vmem:[%s1812_s4 + $0x30] sm:$0xff] }
  0xbd   : > { %746 = vst [vmem:[%s1634_s19 + $0x10] sm:$0xff] %v463_v43  ;;  %v698_v48 = vmul.f32 %v463_v43, %v463_v43  ;;  %520 = vperm.xlu2 %1222, %v398_v29  }
  0xbe   : > { %747 = vst [vmem:[%s1634_s19 + $0x18] sm:$0xff] %v492_v44  ;;  %v699_v50 = vmul.f32 %v492_v44, %v492_v44 }
  0xbf   : > { %v704_v61 = vadd.f32 %v698_v48, %v696_v54 }
  0xc0   : > { %v713_v0 = vadd.f32 %v699_v50, %v697_v58 }
  0xc1   : > { %v553_v49 = vpop.f32.mrf.mxu2 }
  0xc2   : > { %v554_v51 = vadd.f32 %v553_v49, %v511_v47  ;;  %v572_v52 = vpop.f32.mrf.mxu3  ;;  %v465_v53 = vpop.f32.mrf.mxu0 }
  0xc3   : > { %v573_v55 = vadd.f32 %v572_v52, %v511_v47  ;;  %v466_v56 = vadd.f32 %v465_v53, %v422_v30  ;;  %v494_v57 = vpop.f32.mrf.mxu1  ;;  %v516_v8 = vpop.permute.xlu1 %515  ;;  %v773_v52 = vlaneseq }
  0xc4   : > { %v495_v59 = vadd.f32 %v494_v57, %v422_v30 }
  0xc5   : > { %v752_v62 = vpack.c.bf16 %v573_v55, %v554_v51  ;;  %v700_v63 = vmul.f32 %v466_v56, %v466_v56  ;;  %748 = vst [vmem:[%s1634_s19 + $0x20] sm:$0xff] %v466_v56  ;;  %613 = vmatpush.msrb.mxu0 %v466_v56  ;;  %vm1688_vm7 = vcmp.lt.s32.totalorder %v773_v52, 256 }
  0xc6   : > { %v701_v1 = vmul.f32 %v495_v59, %v495_v59  ;;  %749 = vst [vmem:[%s1634_s19 + $0x28] sm:$0xff] %v495_v59  ;;  %636 = vmatpush.msrb.mxu1 %v495_v59  ;;  %s824_s19 = scalar_lea.hbm %s1813_s5, %s1125_s25 }
  0xc7   : > { %756 = vst [vmem:[%s1655_s16] sm:$0xff] %v752_v62  ;;  %v705_v3 = vadd.f32 %v704_v61, %v700_v63  ;;  %614 = vmatpush.msrb.mxu0 %v463_v43  ;;  %s827_s23 = sshll.u32 %s824_s19, 4  ;;  %s828_s23 = int_to_ptr.hbm [resolvable:$true] %s827_s23 }
  0xc8   : > { %v714_v6 = vadd.f32 %v713_v0, %v701_v1  ;;  %637 = vmatpush.msrb.mxu1 %v492_v44  ;;  %s1271_s27 = sshra.s32 %s828_s23, 4  ;;  %s1272_s27 = int_to_ptr.hbm [resolvable:$true] %s1271_s27 }
  0xc9   : > { %v706_v7 = vadd.f32 %v705_v3, %v702_v2  ;;  %v555_v9 = vpop.f32.mrf.mxu2  ;;  %615 = vmatpush.msrb.mxu0 %v460_v34  ;;  %v526_v34 = vpop.permute.xlu0 %525  ;;  %s1273_s12 = scalar_lea.hbm %s1272_s27, 64  ;;  %p1278_p7 = scmp.lt.s32.totalorder %s1272_s27, %s1813_s5 }
  0xca   : > { %v715_v10 = vadd.f32 %v714_v6, %v703_v5  ;;  %v556_v11 = vadd.f32 %v555_v9, %v516_v8  ;;  %v574_v12 = vpop.f32.mrf.mxu3  ;;  %638 = vmatpush.msrb.mxu1 %v489_v35  ;;  %1104 = vmatmul.msk.f32.vlgmr.msrb.gmra.mxu0 %vm429_vm0, %v582_v4  ;;  %p1274_p4 = scmp.ne.s32.totalorder %s1272_s27, %s1273_s12  ;;  %p1279_p8 = scmp.lt.s32.totalorder %s1277_s22, %s1273_s12 }
  0xcb   : > { %v707_v13 = vrot.slane %v706_v7, 4  ;;  %v575_v14 = vadd.f32 %v574_v12, %v516_v8  ;;  %1106 = vmatmul.msk.f32.vlgmr.msrb.gmra.mxu1 %vm429_vm0, %v582_v4 }
  0xcc   : > { %v716_v15 = vrot.slane %v715_v10, 4  ;;  %p1275_p5 = pnand %p1274_p4, %p1540_p9  ;;  %p1280_p10 = por %p1279_p8, %p1278_p7 }
  0xcd   : > { %v708_v17 = vadd.f32 %v707_v13, %v706_v7  ;;  %v753_v18 = vpack.c.bf16 %v575_v14, %v556_v11 }
  0xce   : > { %v717_v19 = vadd.f32 %v716_v15, %v715_v10  ;;  %p1276_p6 = pneg %p1275_p5 }
  0xcf   : > { %v709_v20 = vrot.slane %v708_v17, 2  ;;  %757 = vst [vmem:[%s1655_s16 + $0x8] sm:$0xff] %v753_v18 }
  0xd0   : > { %v718_v22 = vrot.slane %v717_v19, 2  ;;  %p1281_p13 = pnand %p1280_p10, %p1276_p6 }
  0xd1   : > { %v710_v23 = vadd.f32 %v709_v20, %v708_v17  ;;  %v1670_v24 = vpop.f32.mrf.mxu2 }
  0xd2   : > { %v719_v25 = vadd.f32 %v718_v22, %v717_v19  ;;  %v1672_v26 = vpop.f32.mrf.mxu3  ;;  %1105 = vmatmul.msk.f32.gmra.mxu0 %vm429_vm0, %v583_v21 }
  0xd3   : > { %v711_v27 = vrot.slane %v710_v23, 1  ;;  %1107 = vmatmul.msk.f32.gmra.mxu1 %vm429_vm0, %v583_v21 }
  0xd4   : > { %v720_v28 = vrot.slane %v719_v25, 1 }
  0xd5   : > { %v712_v30 = vadd.f32 %v711_v27, %v710_v23 }
  0xd6   : > { %v721_v31 = vadd.f32 %v720_v28, %v719_v25 }
  0xd7   : > { %v722_v32 = vmax.f32 %v712_v30, 1e-08 }
  0xd8   : > { %v723_v33 = vmax.f32 %v721_v31, 1e-08 }
  0xd9   : > { %1223 = vrsqrt.f32 %v722_v32  ;;  %v560_v35 = vpop.f32.mrf.mxu2  ;;  %vm730_vm6 = vweird.f32 %v722_v32 }
  0xda   : > { %1225 = vrsqrt.f32 %v723_v33  ;;  %v561_v37 = vadd.f32 %v560_v35, %v526_v34  ;;  %v579_v38 = vpop.f32.mrf.mxu3  ;;  %vm740_vm3 = vweird.f32 %v723_v33 }
  0xdb   : > { %v580_v39 = vadd.f32 %v579_v38, %v526_v34 }
  0xdd   : > { %v755_v40 = vpack.c.bf16 %v580_v39, %v561_v37 }
  0xdf   : > { %v1224_v41 = vpop.eup %1223  ;;  %759 = vst [vmem:[%s1655_s16 + $0x18] sm:$0xff] %v755_v40 }
  0xe0   : > { %v1226_v42 = vpop.eup %1225  ;;  %v725_v43 = vmul.f32 %v1224_v41, %v722_v32  ;;  %vm731_vm2 = vweird.f32 %v1224_v41 }
  0xe1   : > { %v735_v44 = vmul.f32 %v1226_v42, %v723_v33  ;;  %vm741_vm1 = vweird.f32 %v1226_v42  ;;  %vm1692_vm8 = vmor %vm730_vm6, %vm731_vm2 }
  0xe2   : > { %v726_v45 = vmul.f32 %v1224_v41, %v725_v43  ;;  %vm742_vm4 = vmor %vm740_vm3, %vm741_vm1 }
  0xe3   : > { %v736_v47 = vmul.f32 %v1226_v42, %v735_v44 }
  0xe4   : > { %v727_v48 = vmul.f32 0.5, %v726_v45 }
  0xe5   : > { %v737_v49 = vmul.f32 0.5, %v736_v47 }
  0xe6   : > { %v728_v50 = vsub.f32 1.5, %v727_v48 }
  0xe7   : > { %v738_v51 = vsub.f32 1.5, %v737_v49 }
  0xe8   : > { %v729_v53 = vmul.f32 %v1224_v41, %v728_v50 }
  0xe9   : > { %v739_v54 = vmul.f32 %v1226_v42, %v738_v51 }
  0xea   : > { %v733_v59 = vsel %vm1692_vm8, %v1224_v41, %v729_v53 }
  0xeb   : > { %v743_v55 = vsel %vm742_vm4, %v1226_v42, %v739_v54 }
  0xec   : > { %v791_v58 = vrot.slane %v743_v55, 7 }
  0xed   : > { %1284 = shalt.err (!%p1281_p13)
}
  0xee   : > { %s1436_s14 = smov 256   ;;  %s1437_s19 = smov 16   ;;  %v792_v60 = vsel %vm770_vm5, %v733_v59, %v791_v58 }
  0xef   : > { %1138 = dma.vmem_to_hbm [thread:$0]  (%p1540_p9), %s1682_s21, 1024, %s828_s23, %s796_s15, %s1436_s14, %s1436_s14, %s1437_s19  }
  0xf0   : > { %s377_s13 = scalar_lea.vmem [#allocation9], %s1083_s24  ;;  %s1119_s27 = sshll.u32 %s1423_s30, 1 }
  0xf1   : > { %794 = vst.msk [vmem:[%s377_s13] sm:$0x3] %vm1688_vm7, %v792_v60  ;;  %s878_s22 = scalar_lea.hbm %s1816_s8, %s1119_s27  ;;  %s880_s25 = sshll.u32 %s377_s13, 4  ;;  %s881_s25 = int_to_ptr.vmem [resolvable:$true] %s880_s25 }
  0xf2   : > { %s882_s26 = sshll.u32 %s878_s22, 4  ;;  %s811_s0 = scalar_lea.sflag [#allocation10], %s1565_s9  ;;  %s883_s26 = int_to_ptr.hbm [resolvable:$true] %s882_s26 }
  0xf3   : > { %s1299_s1 = sshra.s32 %s883_s26, 4  ;;  %s1305_s15 = scalar_lea.hbm %s1816_s8, 4  ;;  %s1300_s1 = int_to_ptr.hbm [resolvable:$true] %s1299_s1 }
  0xf4   : > { %s1301_s21 = scalar_lea.hbm %s1300_s1, 2  ;;  %p1306_p3 = scmp.lt.s32.totalorder %s1300_s1, %s1816_s8 }
  0xf5   : > { %p1302_p0 = scmp.ne.s32.totalorder %s1300_s1, %s1301_s21  ;;  %p1307_p4 = scmp.lt.s32.totalorder %s1305_s15, %s1301_s21 }
  0xf7   : > { %p1303_p1 = pnand %p1302_p0, %p1540_p9  ;;  %p1308_p5 = por %p1307_p4, %p1306_p3 }
  0xf9   : > { %p1304_p2 = pneg %p1303_p1 }
  0xfb   : > { %p1309_p6 = pnand %p1308_p5, %p1304_p2 }
  0xfd   : > { %1312 = shalt.err (!%p1309_p6)
}
  0xfe   : > { %1141 = dma.vmem_to_hbm [thread:$0]  (%p1540_p9), %s881_s25, 32, %s883_s26, %s811_s0   ;;  %v592_v61 = vpop.permute.xlu2 %591 }
  0xff   : > { %s1126_s13 = sshll.u32 %s1423_s30, 5  ;;  %s844_s17 = sshll.u32 %s1655_s16, 4  ;;  %s845_s17 = int_to_ptr.vmem [resolvable:$true] %s844_s17 }
 0x100   : > { %s843_s1 = scalar_lea.hbm %s1814_s6, %s1126_s13  ;;  %s800_s22 = sand.u32 1, %s1516_s11  }
 0x101   : > { %s846_s21 = sshll.u32 %s843_s1, 4  ;;  %s1741_s0 = scalar_lea.sflag [#allocation7], %s800_s22  ;;  %s847_s21 = int_to_ptr.hbm [resolvable:$true] %s846_s21 }
 0x102   : > { %s1327_s25 = sshra.s32 %s847_s21, 4  ;;  %s1333_s23 = scalar_lea.hbm %s1814_s6, 64  ;;  %s1328_s25 = int_to_ptr.hbm [resolvable:$true] %s1327_s25 }
 0x103   : > { %s1329_s26 = scalar_lea.hbm %s1328_s25, 32  ;;  %p1334_p13 = scmp.lt.s32.totalorder %s1328_s25, %s1814_s6 }
 0x104   : > { %p1330_p7 = scmp.ne.s32.totalorder %s1328_s25, %s1329_s26  ;;  %p1335_p0 = scmp.lt.s32.totalorder %s1333_s23, %s1329_s26 }
 0x106   : > { %v587_v62 = vpop.permute.xlu2 %586  ;;  %p1331_p8 = pnand %p1330_p7, %p1540_p9  ;;  %p1336_p1 = por %p1335_p0, %p1334_p13 }
 0x108   : > { %p1332_p10 = pneg %p1331_p8 }
 0x10a   : > { %p1337_p2 = pnand %p1336_p1, %p1332_p10 }
 0x10e   : > { %v1730_v63 = vpop.permute.xlu2 %762 }
 0x117   : > { %v521_v0 = vpop.permute.xlu2 %520 }
 0x118   : > { %v559_v1 = vadd.f32 %v1670_v24, %v521_v0  ;;  %v578_v2 = vadd.f32 %v1672_v26, %v521_v0 }
 0x11a   : > { %v754_v3 = vpack.c.bf16 %v578_v2, %v559_v1 }
 0x11c   : > { %758 = vst [vmem:[%s1655_s16 + $0x10] sm:$0xff] %v754_v3 }
 0x11d   : > { %1340 = shalt.err (!%p1337_p2)
}
 0x11e   : > { %s1438_s16 = smov 128   ;;  %s1439_s19 = smov 8  }
 0x11f   : > { %1139 = dma.vmem_to_hbm [thread:$0]  (%p1540_p9), %s845_s17, 512, %s847_s21, %s1741_s0, %s1438_s16, %s1438_s16, %s1439_s19  }
 0x120   : > { %s1082_s13 = sshll.u32 %s1565_s9, 2  ;;  %s1127_s9 = sshll.u32 %s1423_s30, 2 }
 0x121   : > { %s370_s27 = scalar_lea.vmem [#allocation8], %s1082_s13  ;;  %s862_s17 = scalar_lea.hbm %s1815_s7, %s1127_s9 }
 0x122   : > { %s864_s22 = sshll.u32 %s370_s27, 4  ;;  %s866_s21 = sshll.u32 %s862_s17, 4  ;;  %s865_s22 = int_to_ptr.vmem [resolvable:$true] %s864_s22  ;;  %s867_s21 = int_to_ptr.hbm [resolvable:$true] %s866_s21 }
 0x123   : > { %s1355_s25 = sshra.s32 %s867_s21, 4  ;;  %s1361_s24 = scalar_lea.hbm %s1815_s7, 8  ;;  %s1356_s25 = int_to_ptr.hbm [resolvable:$true] %s1355_s25 }
 0x124   : > { %s1357_s26 = scalar_lea.hbm %s1356_s25, 4  ;;  %p1362_p6 = scmp.lt.s32.totalorder %s1356_s25, %s1815_s7 }
 0x125   : > { %p1358_p3 = scmp.ne.s32.totalorder %s1356_s25, %s1357_s26  ;;  %p1363_p7 = scmp.lt.s32.totalorder %s1361_s24, %s1357_s26 }
 0x127   : > { %p1359_p4 = pnand %p1358_p3, %p1540_p9  ;;  %p1364_p8 = por %p1363_p7, %p1362_p6 }
 0x129   : > { %p1360_p5 = pneg %p1359_p4 }
 0x12b   : > { %p1365_p10 = pnand %p1364_p8, %p1360_p5 }
 0x147   : > { %v617_v4 = vpop.f32.mrf.mxu0 }
 0x148   : > { %v618_v5 = vadd.f32 %v617_v4, %v587_v62  ;;  %v640_v6 = vpop.f32.mrf.mxu1 }
 0x149   : > { %v641_v7 = vadd.f32 %v640_v6, %v587_v62 }
 0x14a   : > { %vm646_vm9 = vcmp.ge.f32.partialorder %v618_v5, 0.0  ;;  %v650_v8 = vmul.f32 0.2, %v618_v5 }
 0x14b   : > { %vm647_vm10 = vcmp.ge.f32.partialorder %v641_v7, 0.0  ;;  %v651_v9 = vmul.f32 0.2, %v641_v7 }
 0x14c   : > { %v654_v10 = vsel %vm646_vm9, %v618_v5, %v650_v8 }
 0x14d   : > { %v668_v11 = vmul.f32 %v1647_v46, %v654_v10  ;;  %v655_v12 = vsel %vm647_vm10, %v641_v7, %v651_v9 }
 0x14e   : > { %v669_v13 = vmul.f32 %v1647_v46, %v655_v12 }
 0x14f   : > { %v672_v14 = vrot.slane %v668_v11, 4  ;;  %v620_v15 = vpop.f32.mrf.mxu0 }
 0x150   : > { %v678_v16 = vrot.slane %v669_v13, 4  ;;  %v621_v17 = vadd.f32 %v620_v15, %v592_v61  ;;  %v643_v18 = vpop.f32.mrf.mxu1 }
 0x151   : > { %v673_v19 = vadd.f32 %v672_v14, %v668_v11  ;;  %v644_v20 = vadd.f32 %v643_v18, %v592_v61 }
 0x152   : > { %v679_v21 = vadd.f32 %v678_v16, %v669_v13  ;;  %vm648_vm11 = vcmp.ge.f32.partialorder %v621_v17, 0.0  ;;  %v652_v22 = vmul.f32 0.2, %v621_v17 }
 0x153   : > { %v674_v23 = vrot.slane %v673_v19, 2  ;;  %vm649_vm12 = vcmp.ge.f32.partialorder %v644_v20, 0.0  ;;  %v653_v24 = vmul.f32 0.2, %v644_v20 }
 0x154   : > { %v680_v25 = vrot.slane %v679_v21, 2  ;;  %v656_v26 = vsel %vm648_vm11, %v621_v17, %v652_v22 }
 0x155   : > { %v670_v27 = vmul.f32 %v1638_v36, %v656_v26  ;;  %v657_v28 = vsel %vm649_vm12, %v644_v20, %v653_v24  ;;  %v675_v46 = vadd.f32 %v674_v23, %v673_v19 }
 0x156   : > { %v671_v29 = vmul.f32 %v1638_v36, %v657_v28  ;;  %v681_v30 = vadd.f32 %v680_v25, %v679_v21 }
 0x157   : > { %v684_v31 = vrot.slane %v670_v27, 4  ;;  %v676_v32 = vrot.slane %v675_v46, 1 }
 0x158   : > { %v690_v33 = vrot.slane %v671_v29, 4  ;;  %v682_v34 = vrot.slane %v681_v30, 1 }
 0x159   : > { %v685_v35 = vadd.f32 %v684_v31, %v670_v27  ;;  %v677_v38 = vadd.f32 %v676_v32, %v675_v46 }
 0x15a   : > { %v691_v37 = vadd.f32 %v690_v33, %v671_v29  ;;  %v683_v39 = vadd.f32 %v682_v34, %v681_v30 }
 0x15b   : > { %v686_v40 = vrot.slane %v685_v35, 2  ;;  %v765_v45 = vadd.f32 %v1730_v63, %v677_v38 }
 0x15c   : > { %v692_v41 = vrot.slane %v691_v37, 2  ;;  %v766_v42 = vadd.f32 %v1730_v63, %v683_v39 }
 0x15d   : > { %v687_v43 = vadd.f32 %v686_v40, %v685_v35 }
 0x15e   : > { %v693_v44 = vadd.f32 %v692_v41, %v691_v37  ;;  %v769_v36 = vrot.slane %v766_v42, 7 }
 0x15f   : > { %v688_v47 = vrot.slane %v687_v43, 1 }
 0x160   : > { %v694_v48 = vrot.slane %v693_v44, 1  ;;  %v771_v49 = vsel %vm770_vm5, %v765_v45, %v769_v36 }
 0x161   : > { %v689_v50 = vadd.f32 %v688_v47, %v687_v43  ;;  %777 = vst.msk [vmem:[%s370_s27] ss:$2 sm:$0x3] %vm1688_vm7, %v771_v49 }
 0x162   : > { %v695_v51 = vadd.f32 %v694_v48, %v693_v44 }
 0x163   : > { %v778_v52 = vadd.f32 %v1730_v63, %v689_v50 }
 0x164   : > { %v779_v53 = vadd.f32 %v1730_v63, %v695_v51 }
 0x165   : > { %782 = vst [vmem:[#allocation1] sm:$0xff] %v778_v52 }
 0x166   : > { %783 = vst [vmem:[#allocation1 + $0x9] sm:$0xff] %v779_v53 }
 0x16d   : > { %v785_v54 = vld [vmem:[#allocation1 + $0x1] ss:$9 sm:$0xff] }
 0x16e   : > { %1108 = vst.msk [vmem:[%s370_s27 + $0x1] ss:$2 sm:$0x3] %vm1688_vm7, %v785_v54 }
 0x16f   : > { %1368 = shalt.err (!%p1365_p10)
}
 0x170   : > { %1140 = dma.vmem_to_hbm [thread:$0]  (%p1540_p9), %s865_s22, 64, %s867_s21, %s1741_s0  }
 0x171 PF: > { %s1837_s14 = sld [smem:[#allocation15_spill]]  ;;  %p1151_p13 = pnand %p1074_p12, %p1549_p11 }
 0x173   : > { %p1152_p0 = pneg %p1151_p13 }
 0x177   : > { %s894_s16 = sand.u32 1, %s1837_s14  }
 0x178   : > { %s895_s19 = scalar_lea.sflag [#allocation4], %s894_s16 }
 0x179   : > { %1398 = dma.done.wait (%p1152_p0), %s895_s19, 1024  }
 0x17a   : > { %1400 = vsyncadd (%p1152_p0), %s895_s19, 4294966272  ;;  %s1838_s13 = sadd.s32 4294967294, %s1431_s10  }
 0x17b   : > { %s904_s27 = sand.u32 1, %s1838_s13  }
 0x17c   : > { %s905_s9 = scalar_lea.sflag [#allocation7], %s904_s27 }
 0x17d   : > { %1402 = dma.done.wait (%p1152_p0), %s905_s9, 576  }
 0x17e   : > { %1404 = vsyncadd (%p1152_p0), %s905_s9, 4294966720  ;;  %s925_s18 = scalar_lea.sflag [#allocation10], %s894_s16 }
 0x17f   : > { %1406 = dma.done.wait (%p1152_p0), %s925_s18, 32  }
 0x180   : > { %1408 = vsyncadd (%p1152_p0), %s925_s18, 4294967264  ;;  %s31_s10 = sadd.s32 1, %s1431_s10   ;;  %s1839_s20 = sld [smem:[#allocation18_spill]] }
 0x181   : > { %p28_p9 = scmp.ge.s32.totalorder %s31_s10, 4   ;;  %s1840_s30 = sld [smem:[#allocation16_spill]] }
 0x182   : > { %s1841_s9 = sld [smem:[#allocation17_spill]]  ;;  %s1842_s27 = smov %s1415_s28 }
 0x183   : > { %s1843_s28 = smov %s1419_s29  ;;  %30 = sbr.rel (!%p28_p9) target bundleno = 13 (0xd), region = 136 }
 0x186   : > { %s1844_s29 = smov %s1839_s20 }
 0x188   :  { %931 = vsyncpa [#allocation3], 1 }
 0x189   :  { %933 = vsyncpa [#allocation3 + $0x1], 1 }
 0x18a   :  { %934 = vsyncpa [#allocation4], 1 }
 0x18b   :  { %936 = vsyncpa [#allocation4 + $0x1], 1 }
 0x18c   :  { %937 = vsyncpa [#allocation7], 1 }
 0x18d   :  { %939 = vsyncpa [#allocation7 + $0x1], 1 }
 0x18e   :  { %940 = vsyncpa [#allocation10], 1 }
 0x18f   :  { %942 = vsyncpa [#allocation10 + $0x1], 1 }

</bundles_post_ra>
